<compile_context>
chip_gen: v5e
topology: v5e:2x2
jax: 0.10.0
libtpu: 0.0.40
codegen_flags: <defaults>
</compile_context>

<pallas_src>
import math
import functools

import jax
import jax.numpy as jnp
from jax.experimental import pallas as pl
from jax.experimental.pallas import tpu as pltpu


def _round_up(x, m):
    return ((x + m - 1) // m) * m


def _ceil_div(a, b):
    return -(-a // b)


# -----------------------------------------------------------------------------
# Pallas kernel: fused (linear_2 o linear_1) + bias adds + SiLU + linear_3
# -----------------------------------------------------------------------------
def _action_encoder_kernel(act_ref, gbias_ref, pos_ref, w12_ref, w3_ref, out_ref):
    """One row tile = `g` (batch*context) groups x `h` horizon steps.

    act_ref   : (g*h, A_pad)   bf16  noisy actions, flattened rows
    gbias_ref : (g, D_pad)     f32   cmd@W2a^T + diff_emb@W2d^T, one row per group
    pos_ref   : (h, D_pad)     f32   action positional embedding folded through W2a
    w12_ref   : (A_pad, D_pad) bf16  (W2a @ W1)^T  (fused linear_1 + action half of linear_2)
    w3_ref    : (D_pad, D_pad) bf16  linear_3 weight, transposed
    out_ref   : (g*h, D_pad)   bf16
    """
    g = gbias_ref.shape[0]
    h = pos_ref.shape[0]
    d = out_ref.shape[-1]

    # Fused linear on the MXU (bf16 inputs, f32 accumulation).
    pre = jnp.dot(act_ref[...], w12_ref[...], preferred_element_type=jnp.float32)

    # + per-(b,t) group bias + per-horizon positional bias (implicit broadcast,
    # no materialized (rows, d) f32 temporaries).
    pre = pre.reshape(g, h, d)
    pre = pre + gbias_ref[...].reshape(g, 1, d) + pos_ref[...].reshape(1, h, d)

    # SiLU in f32 (v5e has no bf16 VPU/EUP).
    hid = pre * jax.nn.sigmoid(pre)

    # linear_3.
    out = jnp.dot(hid.reshape(g * h, d).astype(jnp.bfloat16), w3_ref[...],
                  preferred_element_type=jnp.float32)
    out_ref[...] = out.astype(out_ref.dtype)


# -----------------------------------------------------------------------------
# Tiling choice: gt groups per tile (sublane-aligned and/or padding-free)
# -----------------------------------------------------------------------------
def _pick_group_tile(bt, h_pad, target_rows):
    """Pick (gt, n_tiles). gt is a multiple of 8 (sublane-dense 2D group-bias
    blocks) unless a single tile covers the whole (b,t) axis (block == array is
    always layout-legal)."""
    max_gt = max(8, ((target_rows // h_pad) // 8) * 8)
    if bt <= max_gt:
        if bt >= 16 and bt % 16 == 0:
            return bt // 2, 2           # two balanced sublane-aligned tiles (megacore)
        return bt, 1                    # single full tile
    # Multi-tile: largest multiple-of-8 gt <= max_gt that divides bt (no padding).
    for g in range(max_gt, 7, -8):
        if bt % g == 0:
            return g, bt // g
    return max_gt, _ceil_div(bt, max_gt)  # fallback: pad the (b,t) axis


# -----------------------------------------------------------------------------
# One-time parameter preparation (hoisted out of the jitted hot path)
# -----------------------------------------------------------------------------
def prepare_action_encoder(params):
    w1 = params["W1"]                    # (D, A)
    w2 = params["W2"]                    # (D, 2D)
    w3 = params["W3"]                    # (D, D)
    d, a = w1.shape
    h = params["pos_emb"].shape[0]
    w2d = w2[:, :d]                      # diffusion half
    w2a = w2[:, d:]                      # action half

    a_pad = _round_up(a, 8)
    d_pad = _round_up(d, 128)
    h_pad = _round_up(h, 8)

    # Fused weight, computed in f32 before the single bf16 cast.
    w12 = w2a @ w1                                                     # (D, A)
    w12_t = jnp.pad(w12.T, ((0, a_pad - a), (0, d_pad - d))).astype(jnp.bfloat16)
    w3_t = jnp.pad(w3.T, ((0, d_pad - d), (0, d_pad - d))).astype(jnp.bfloat16)

    # Embedding tables folded through the action half of linear_2 (f32, tiny).
    cmd_bias = jnp.pad(params["cmd_emb"] @ w2a.T, ((0, 0), (0, d_pad - d)))        # (C, D_pad)
    pos_bias = jnp.pad(params["pos_emb"] @ w2a.T, ((0, h_pad - h), (0, d_pad - d)))  # (H_pad, D_pad)

    # Diffusion half of linear_2, kept f32 for the small per-(b,t) projection.
    w2d_t = jnp.pad(w2d.T, ((0, 0), (0, d_pad - d)))                   # (D, D_pad)

    prep = {"w12_t": w12_t, "w3_t": w3_t, "cmd_bias": cmd_bias,
            "pos_bias": pos_bias, "w2d_t": w2d_t}
    dims = (a, d, h)
    return prep, dims


# -----------------------------------------------------------------------------
# Module wrapper (glue in plain JAX, hot path in the Pallas kernel)
# -----------------------------------------------------------------------------
def sinusoidal_pos_emb(t, dim, max_period=10000.0):
    half = dim // 2
    emb = math.log(max_period) / (half - 1)
    freqs = jnp.exp(jnp.arange(half, dtype=jnp.float32) * -emb)
    args = t[:, None].astype(jnp.float32) * freqs[None, :]
    return jnp.concatenate([jnp.sin(args), jnp.cos(args)], axis=-1)


def init_action_encoder_params(key, action_dim, action_hidden_dim,
                               action_horizon, number_high_level_command):
    ks = jax.random.split(key, 5)
    d = action_hidden_dim

    def linear_w(k, fan_in, fan_out):
        bound = 1.0 / math.sqrt(fan_in)
        return jax.random.uniform(k, (fan_out, fan_in), jnp.float32, -bound, bound)

    return {
        "W1": linear_w(ks[0], action_dim, d),            # (D, A)
        "W2": linear_w(ks[1], 2 * d, d),                 # (D, 2D)
        "W3": linear_w(ks[2], d, d),                     # (D, D)
        "cmd_emb": jax.random.normal(ks[3], (number_high_level_command, d), jnp.float32),
        "pos_emb": jax.random.normal(ks[4], (action_horizon, d), jnp.float32),
    }


@functools.partial(jax.jit, static_argnames=("dims", "max_period", "target_rows"))
def action_encoder_forward(prep, actions, high_level_command, diffusion_step, *,
                           dims, max_period=10000.0, target_rows=1024):
    a, d, h = dims
    bs, ctx, horizon, a_dim = actions.shape
    bt = bs * ctx

    a_pad = prep["w12_t"].shape[0]
    d_pad = prep["w12_t"].shape[1]
    h_pad = prep["pos_bias"].shape[0]

    # --- Glue (bt rows only): sinusoidal diffusion emb + group bias -----------
    diff_emb = sinusoidal_pos_emb(diffusion_step.reshape(-1), d, max_period)       # (bt, D) f32
    group_bias = (prep["cmd_bias"][high_level_command.reshape(-1)]
                  + diff_emb @ prep["w2d_t"])                                       # (bt, D_pad) f32

    # --- Tiling ----------------------------------------------------------------
    gt, n_tiles = _pick_group_tile(bt, h_pad, target_rows)
    bt_pad = gt * n_tiles
    rows_blk = gt * h_pad

    # --- Pad / cast streamed inputs ---------------------------------------------
    act3 = jnp.pad(actions.reshape(bt, horizon, a_dim),
                   ((0, bt_pad - bt), (0, h_pad - horizon), (0, a_pad - a_dim))
                   ).astype(jnp.bfloat16)
    act2 = act3.reshape(bt_pad * h_pad, a_pad)
    if bt_pad != bt:
        group_bias = jnp.pad(group_bias, ((0, bt_pad - bt), (0, 0)))

    # --- Explicit VMEM budget (v7x has 64 MiB physical / 32 MiB scoped default) --
    stream = (rows_blk * a_pad * 2          # actions tile (bf16)
              + gt * d_pad * 4              # group-bias tile (f32)
              + rows_blk * d_pad * 2)       # output tile (bf16)
    resident = (h_pad * d_pad * 4           # positional bias (f32)
                + a_pad * d_pad * 2         # W12^T (bf16)
                + d_pad * d_pad * 2)        # W3^T (bf16)
    vmem_limit = int(min(max(2 * (stream + resident) + (4 << 20), 16 << 20), 48 << 20))

    # TODO(synk): for very large D (>=2048) add a K-tiled "arbitrary" grid axis with an
    #             f32 VMEM accumulator, and single-buffer the grid-invariant weight
    #             blocks (pipeline_mode=pl.Buffered(1)) to stay inside v7x's 64 MiB.

    out = pl.pallas_call(
        _action_encoder_kernel,
        out_shape=jax.ShapeDtypeStruct((bt_pad * h_pad, d_pad), jnp.bfloat16),
        grid_spec=pltpu.PrefetchScalarGridSpec(
            num_scalar_prefetch=0,
            grid=(n_tiles,),
            in_specs=[
                pl.BlockSpec((rows_blk, a_pad), lambda i: (i, 0)),   # action rows
                pl.BlockSpec((gt, d_pad), lambda i: (i, 0)),         # group bias rows (2D, sublane-dense)
                pl.BlockSpec((h_pad, d_pad), lambda i: (0, 0)),      # positional bias (invariant)
                pl.BlockSpec((a_pad, d_pad), lambda i: (0, 0)),      # W12^T (invariant)
                pl.BlockSpec((d_pad, d_pad), lambda i: (0, 0)),      # W3^T (invariant)
            ],
            out_specs=pl.BlockSpec((rows_blk, d_pad), lambda i: (i, 0)),
        ),
        compiler_params=pltpu.CompilerParams(
            dimension_semantics=("parallel",),
            vmem_limit_bytes=vmem_limit),
    )(act2, group_bias, prep["pos_bias"], prep["w12_t"], prep["w3_t"])

    out = out.reshape(bt_pad, h_pad, d_pad)[:bt, :horizon, :d]
    return out.reshape(bs, ctx, horizon, d)


# -----------------------------------------------------------------------------
# Pure-JAX reference (mirrors the PyTorch module, f32 throughout)
# -----------------------------------------------------------------------------
def action_encoder_reference(params, actions, high_level_command, diffusion_step,
                             max_period=10000.0):
    bs, ctx, horizon, a_dim = actions.shape
    d = params["W1"].shape[0]
    act_emb = actions @ params["W1"].T
    cmd = params["cmd_emb"][high_level_command][:, :, None, :]
    pos = params["pos_emb"][jnp.arange(horizon)][None, None, :, :]
    act_emb = act_emb + cmd + pos
    diff = sinusoidal_pos_emb(diffusion_step.reshape(-1), d, max_period).reshape(bs, ctx, d)
    diff4 = jnp.broadcast_to(diff[:, :, None, :], (bs, ctx, horizon, d))
    x = jnp.concatenate([diff4, act_emb], axis=-1) @ params["W2"].T
    x = x * jax.nn.sigmoid(x)
    return x @ params["W3"].T


if __name__ == "__main__":
    key = jax.random.PRNGKey(0)
    k_param, k_act, k_cmd, k_t = jax.random.split(key, 4)

    # Small shapes consistent with the module.
    bs, ctx, horizon = 2, 2, 8
    action_dim, action_hidden_dim = 4, 32
    number_high_level_command = 6

    params = init_action_encoder_params(
        k_param, action_dim, action_hidden_dim, horizon, number_high_level_command)
    prep, dims = prepare_action_encoder(params)

    actions = jax.random.normal(k_act, (bs, ctx, horizon, action_dim), jnp.float32)
    high_level_command = jax.random.randint(k_cmd, (bs, ctx), 0, number_high_level_command)
    diffusion_step = jax.random.uniform(k_t, (bs, ctx), jnp.float32, 0.0, 1000.0)

    out = action_encoder_forward(prep, actions, high_level_command, diffusion_step, dims=dims)
    out = jax.block_until_ready(out)

    ref = action_encoder_reference(params, actions, high_level_command, diffusion_step)
    assert out.shape == (bs, ctx, horizon, action_hidden_dim)
    assert out.dtype == jnp.bfloat16

    # bf16 streaming / bf16 output with f32 MXU accumulation => compare against
    # the f32 reference with a bf16-appropriate tolerance (documented deviation).
    out_f32 = out.astype(jnp.float32)
    max_err = float(jnp.max(jnp.abs(out_f32 - ref)))
    assert jnp.allclose(out_f32, ref, atol=2.5e-2, rtol=2.5e-2), (
        "mismatch vs reference: max abs err %e" % max_err)

    print("KERNEL_OK")
</pallas_src>

<mosaic_0001>
module attributes {stable_mosaic.version = 11 : i64} {
  func.func @_action_encoder_kernel(%arg0: i32, %arg1: memref<32x8xbf16, #tpu.memory_space<vmem>>, %arg2: memref<4x128xf32, #tpu.memory_space<vmem>>, %arg3: memref<8x128xf32, #tpu.memory_space<vmem>>, %arg4: memref<8x128xbf16, #tpu.memory_space<vmem>>, %arg5: memref<128x128xbf16, #tpu.memory_space<vmem>>, %arg6: memref<32x128xbf16, #tpu.memory_space<vmem>>) attributes {dimension_semantics = [#tpu.dimension_semantics<parallel>], iteration_bounds = array<i64: 1>, scalar_prefetch = 0 : i64, scratch_operands = 0 : i64, tpu.core_type = #tpu.core_type<tc>, window_params = [{transform_indices = @transform_0, window_bounds = array<i64: 32, 8>}, {transform_indices = @transform_1, window_bounds = array<i64: 4, 128>}, {pipeline_mode = #tpu.pipeline_mode<synchronous>, transform_indices = @transform_2, window_bounds = array<i64: 8, 128>}, {pipeline_mode = #tpu.pipeline_mode<synchronous>, transform_indices = @transform_3, window_bounds = array<i64: 8, 128>}, {pipeline_mode = #tpu.pipeline_mode<synchronous>, transform_indices = @transform_4, window_bounds = array<i64: 128, 128>}, {transform_indices = @transform_5, window_bounds = array<i64: 32, 128>}]} {
    %c0 = arith.constant 0 : index
    %c0_0 = arith.constant 0 : index
    %0 = vector.load %arg1[%c0, %c0_0] : memref<32x8xbf16, #tpu.memory_space<vmem>>, vector<32x8xbf16>
    %c0_1 = arith.constant 0 : index
    %c0_2 = arith.constant 0 : index
    %1 = vector.load %arg4[%c0_1, %c0_2] : memref<8x128xbf16, #tpu.memory_space<vmem>>, vector<8x128xbf16>
    %cst = arith.constant dense<0.000000e+00> : vector<32x128xf32>
    %2 = tpu.matmul %0, %1, %cst {dimension_numbers = #tpu.dot_dimension_numbers<[1], [0], [0], [1], [0, 0, 1, 1], [], []>} : vector<32x8xbf16>, vector<8x128xbf16>, vector<32x128xf32> -> vector<32x128xf32>
    %3 = vector.shape_cast %2 : vector<32x128xf32> to vector<4x8x128xf32>
    %c0_3 = arith.constant 0 : index
    %c0_4 = arith.constant 0 : index
    %4 = vector.load %arg2[%c0_3, %c0_4] : memref<4x128xf32, #tpu.memory_space<vmem>>, vector<4x128xf32>
    %5 = vector.shape_cast %4 : vector<4x128xf32> to vector<4x1x128xf32>
    %6 = vector.broadcast %5 : vector<4x1x128xf32> to vector<4x8x128xf32>
    %7 = arith.addf %3, %6 : vector<4x8x128xf32>
    %c0_5 = arith.constant 0 : index
    %c0_6 = arith.constant 0 : index
    %8 = vector.load %arg3[%c0_5, %c0_6] : memref<8x128xf32, #tpu.memory_space<vmem>>, vector<8x128xf32>
    %9 = vector.shape_cast %8 : vector<8x128xf32> to vector<1x8x128xf32>
    %10 = vector.broadcast %9 : vector<1x8x128xf32> to vector<4x8x128xf32>
    %11 = arith.addf %7, %10 : vector<4x8x128xf32>
    %12 = arith.negf %11 : vector<4x8x128xf32>
    %13 = math.exp %12 : vector<4x8x128xf32>
    %cst_7 = arith.constant 1.000000e+00 : f32
    %14 = vector.broadcast %cst_7 : f32 to vector<4x8x128xf32>
    %15 = arith.addf %14, %13 : vector<4x8x128xf32>
    %16 = arith.divf %14, %15 : vector<4x8x128xf32>
    %17 = arith.mulf %11, %16 : vector<4x8x128xf32>
    %18 = vector.shape_cast %17 : vector<4x8x128xf32> to vector<32x128xf32>
    %19 = arith.truncf %18 : vector<32x128xf32> to vector<32x128xbf16>
    %c0_8 = arith.constant 0 : index
    %c0_9 = arith.constant 0 : index
    %20 = vector.load %arg5[%c0_8, %c0_9] : memref<128x128xbf16, #tpu.memory_space<vmem>>, vector<128x128xbf16>
    %cst_10 = arith.constant dense<0.000000e+00> : vector<32x128xf32>
    %21 = tpu.matmul %19, %20, %cst_10 {dimension_numbers = #tpu.dot_dimension_numbers<[1], [0], [0], [1], [0, 0, 1, 1], [], []>} : vector<32x128xbf16>, vector<128x128xbf16>, vector<32x128xf32> -> vector<32x128xf32>
    %22 = arith.truncf %21 : vector<32x128xf32> to vector<32x128xbf16>
    %c0_11 = arith.constant 0 : index
    %c0_12 = arith.constant 0 : index
    %23 = vector.load %arg6[%c0_11, %c0_12] : memref<32x128xbf16, #tpu.memory_space<vmem>>, vector<32x128xbf16>
    tpu.vector_store %arg6[%c0_11, %c0_12], %22 {strides = array<i32>} : memref<32x128xbf16, #tpu.memory_space<vmem>>, vector<32x128xbf16>,
    return
  }
  func.func @transform_0(%arg0: i32) -> (i32, i32) {
    %c0_i32 = arith.constant 0 : i32
    %c0_i32_0 = arith.constant 0 : i32
    return %arg0, %c0_i32 : i32, i32
  }
  func.func @transform_1(%arg0: i32) -> (i32, i32) {
    %c0_i32 = arith.constant 0 : i32
    %c0_i32_0 = arith.constant 0 : i32
    return %arg0, %c0_i32 : i32, i32
  }
  func.func @transform_2(%arg0: i32) -> (i32, i32) {
    %c0_i32 = arith.constant 0 : i32
    %c0_i32_0 = arith.constant 0 : i32
    %c0_i32_1 = arith.constant 0 : i32
    return %c0_i32, %c0_i32_0 : i32, i32
  }
  func.func @transform_3(%arg0: i32) -> (i32, i32) {
    %c0_i32 = arith.constant 0 : i32
    %c0_i32_0 = arith.constant 0 : i32
    %c0_i32_1 = arith.constant 0 : i32
    return %c0_i32, %c0_i32_0 : i32, i32
  }
  func.func @transform_4(%arg0: i32) -> (i32, i32) {
    %c0_i32 = arith.constant 0 : i32
    %c0_i32_0 = arith.constant 0 : i32
    %c0_i32_1 = arith.constant 0 : i32
    return %c0_i32, %c0_i32_0 : i32, i32
  }
  func.func @transform_5(%arg0: i32) -> (i32, i32) {
    %c0_i32 = arith.constant 0 : i32
    %c0_i32_0 = arith.constant 0 : i32
    return %arg0, %c0_i32 : i32, i32
  }
}

</mosaic_0001>

<bundles_post_ra>
// kernel: mul.10
= control target key start
LH: loop header
LB: loop body
LE: loop exit
PB: predicated region body
PF: predicated region fallthrough
CT: control target
= control target key end

     0   :  { %vm7_vm0 = vcmask 15360   ;;  %vm13_vm1 = vcmask 31760   ;;  %s39_s0 = inlined_call_operand.vmem [shape: f32[2,2], index: 0, kind: input, shape index: {}]   ;;  %s40_s1 = inlined_call_operand.vmem [shape: f32[4], index: 1, kind: output, shape index: {}]  }
   0x1   :  { %v4_v0 = vld [vmem:[%s39_s0] sm:$0x3]  ;;  %s22_s0 = smov 2  }
   0x2   :  { %5 = vst [vmem:[#allocation1] sm:$0x3] %v4_v0 }
   0x9   :  { %v10_v1 = vld [vmem:[#allocation1 + $0x1] sm:$0x1]   ;;  %v6_v2 = vld [vmem:[#allocation1] sm:$0x1]  }
   0xa   :  { %11 = vrot.lane.b32.xlu0 %v10_v1, %s22_s0  ;;  %8 = vst.msk [vmem:[#allocation0] sm:$0x1] %vm7_vm0, %v6_v2  }
  0x7c   :  { %v12_v3 = vpop.permute.xlu0 %11  }
  0x7d   :  { %14 = vst.msk [vmem:[#allocation0] sm:$0x1] %vm13_vm1, %v12_v3  }
  0x84   :  { %v17_v4 = vld [vmem:[#allocation0] sm:$0x1] }
  0x85   :  { %20 = vst [vmem:[%s40_s1] sm:$0x1] %v17_v4 }

// kernel: action_encoder_forward.1
= control target key start
LH: loop header
LB: loop body
LE: loop exit
PB: predicated region body
PF: predicated region fallthrough
CT: control target
= control target key end

     0   :  { %vm44_vm0 = vcmask 1043456   ;;  %s487_s0 = inlined_call_operand.vmem [shape: bf16[32,8], index: 0, kind: input, shape index: {}]   ;;  %s488_s1 = inlined_call_operand.vmem [shape: f32[4,128], index: 1, kind: input, shape index: {}]   ;;  %s489_s2 = inlined_call_operand.vmem [shape: f32[8,128], index: 2, kind: input, shape index: {}]   ;;  %s490_s3 = inlined_call_operand.vmem [shape: bf16[8,128], index: 3, kind: input, shape index: {}]   ;;  %s491_s4 = inlined_call_operand.vmem [shape: bf16[128,128], index: 4, kind: input, shape index: {}]   ;;  %s492_s5 = inlined_call_operand.hbm [shape: bf16[32,128], index: 5, kind: output, shape index: {}]  }
   0x1   :  { %v26_v0 = vld [vmem:[%s490_s3] sm:$0xf] }
   0x2   :  { %v46_v1 = vsel %vm44_vm0, %v26_v0, 0  ;;  %v326_v2 = vld [vmem:[%s487_s0] sm:$0xff] }
   0x3   :  { %10 = vsyncpa [#allocation3], 0  ;;  %55 = vmatpush.bf16.msra.mxu0 %v46_v1  ;;  %vm37_vm1 = vcmask 64512   ;;  %v327_v3 = vld [vmem:[%s487_s0 + $0x8] sm:$0xff]  ;;  %v335_v4 = vld [vmem:[%s491_s4 + $0x38] sm:$0xff]  ;;  %s268_s18 = sshll.u32 %s492_s5, 4  ;;  %s269_s18 = int_to_ptr.hbm [resolvable:$true] %s268_s18 }
   0x4   :  { %235 = vmatpush.bf16.msra.mxu1 %v335_v4  ;;  %347 = vmatpush.bf16.msra.mxu2 %v335_v4  ;;  %v334_v5 = vld [vmem:[%s491_s4 + $0x30] sm:$0xff]  ;;  %v333_v6 = vld [vmem:[%s491_s4 + $0x28] sm:$0xff]  ;;  %v332_v7 = vld [vmem:[%s491_s4 + $0x20] sm:$0xff]  ;;  %s401_s19 = smov 64   ;;  %s402_s20 = smov 4  }
   0x5   :  { %v67_v8 = vld [vmem:[%s488_s1] sm:$0xf]  ;;  %v331_v9 = vld [vmem:[%s491_s4 + $0x18] sm:$0xff]  ;;  %v330_v13 = vld [vmem:[%s491_s4 + $0x10] sm:$0xff] }
   0x6   :  { %288 = vmatmul.msk.bf16.vlgmr.msra.gmra.mxu0 %vm37_vm1, %v326_v2  ;;  %v72_v10 = vperm.slane %v67_v8, 0  ;;  %v84_v12 = vld [vmem:[%s489_s2] sm:$0xff]  ;;  %v69_v15 = vrot.slane %v67_v8, 1  ;;  %v329_v17 = vld [vmem:[%s491_s4 + $0x8] sm:$0xff]  ;;  %v70_v23 = vrot.slane %v67_v8, 2  ;;  %v71_v31 = vrot.slane %v67_v8, 3 }
   0x7   :  { %v328_v21 = vld [vmem:[%s491_s4] sm:$0xff]  ;;  %s400_s4 = smov [#allocation2]  }
   0x8   :  { %236 = vmatpush.bf16.msra.mxu1 %v334_v5  ;;  %348 = vmatpush.bf16.msra.mxu2 %v334_v5  ;;  %v73_v19 = vperm.slane %v69_v15, 0  ;;  %v74_v27 = vperm.slane %v70_v23, 0  ;;  %v75_v35 = vperm.slane %v71_v31, 0  ;;  %s266_s15 = sshll.u32 %s400_s4, 4  ;;  %s267_s15 = int_to_ptr.vmem [resolvable:$true] %s266_s15 }
   0xc   :  { %237 = vmatpush.bf16.msra.mxu1 %v333_v6  ;;  %349 = vmatpush.bf16.msra.mxu2 %v333_v6 }
  0x10   :  { %238 = vmatpush.bf16.msra.mxu1 %v332_v7  ;;  %350 = vmatpush.bf16.msra.mxu2 %v332_v7 }
  0x14   :  { %239 = vmatpush.bf16.msra.mxu1 %v331_v9  ;;  %351 = vmatpush.bf16.msra.mxu2 %v331_v9 }
  0x16   :  { %289 = vmatmul.msk.bf16.gmra.mxu0 %vm37_vm1, %v327_v3 }
  0x18   :  { %240 = vmatpush.bf16.msra.mxu1 %v330_v13  ;;  %352 = vmatpush.bf16.msra.mxu2 %v330_v13 }
  0x1c   :  { %241 = vmatpush.bf16.msra.mxu1 %v329_v17  ;;  %353 = vmatpush.bf16.msra.mxu2 %v329_v17 }
  0x20   :  { %242 = vmatpush.bf16.msra.mxu1 %v328_v21  ;;  %354 = vmatpush.bf16.msra.mxu2 %v328_v21 }
  0x83   :  { %v57_v11 = vpop.f32.mrf.mxu0 }
  0x84   :  { %v80_v14 = vadd.f32 %v72_v10, %v57_v11 }
  0x86   :  { %v466_v16 = vadd.f32 %v84_v12, %v80_v14 }
  0x88   :  { %v290_v18 = vmul.f32 -1.442695, %v466_v16 }
  0x8a   :  { %358 = vpow2.f32 %v290_v18 }
  0x8b   :  { %v59_v20 = vpop.f32.mrf.mxu0 }
  0x8c   :  { %v81_v22 = vadd.f32 %v73_v19, %v59_v20 }
  0x8e   :  { %v86_v24 = vadd.f32 %v84_v12, %v81_v22 }
  0x90   :  { %v359_v25 = vpop.eup %358  ;;  %v291_v26 = vmul.f32 -1.442695, %v86_v24 }
  0x91   :  { %v101_v28 = vadd.f32 1.0, %v359_v25 }
  0x92   :  { %360 = vpow2.f32 %v291_v26 }
  0x93   :  { %362 = vrcp.f32 %v101_v28  ;;  %v62_v29 = vpop.f32.mrf.mxu0  ;;  %v116_v50 = vand.u32 2147483648, %v101_v28  ;;  %vm110_vm3 = vweird.f32 %v101_v28  ;;  %v114_v51 = vand.u32 2147483647, %v101_v28 }
  0x94   :  { %v82_v30 = vadd.f32 %v74_v27, %v62_v29 }
  0x95   :  { %v117_v57 = vor.u32 1.1754944e-38, %v116_v50  ;;  %vm115_vm6 = vcmp.eq.f32.partialorder %v114_v51, 8.507059e+37 }
  0x96   :  { %v475_v32 = vadd.f32 %v84_v12, %v82_v30 }
  0x98   :  { %v361_v33 = vpop.eup %360  ;;  %v292_v34 = vmul.f32 -1.442695, %v475_v32 }
  0x99   :  { %v363_v36 = vpop.eup %362  ;;  %v102_v37 = vadd.f32 1.0, %v361_v33 }
  0x9a   :  { %364 = vpow2.f32 %v292_v34  ;;  %v106_v38 = vmul.f32 %v363_v36, %v101_v28  ;;  %vm111_vm2 = vweird.f32 %v363_v36 }
  0x9b   :  { %366 = vrcp.f32 %v102_v37  ;;  %v64_v39 = vpop.f32.mrf.mxu0  ;;  %vm112_vm4 = vmor %vm110_vm3, %vm111_vm2  ;;  %v131_v53 = vand.u32 2147483648, %v102_v37  ;;  %v129_v56 = vand.u32 2147483647, %v102_v37  ;;  %vm125_vm7 = vweird.f32 %v102_v37 }
  0x9c   :  { %v83_v40 = vadd.f32 %v75_v35, %v64_v39  ;;  %v107_v41 = vsub.f32 1.0, %v106_v38 }
  0x9d   :  { %v132_v63 = vor.u32 1.1754944e-38, %v131_v53  ;;  %vm130_vm9 = vcmp.eq.f32.partialorder %v129_v56, 8.507059e+37 }
  0x9e   :  { %v478_v42 = vadd.f32 %v84_v12, %v83_v40  ;;  %v108_v43 = vmul.f32 %v363_v36, %v107_v41 }
  0xa0   :  { %v365_v44 = vpop.eup %364  ;;  %v293_v45 = vmul.f32 -1.442695, %v478_v42  ;;  %v109_v48 = vadd.f32 %v363_v36, %v108_v43 }
  0xa1   :  { %v367_v46 = vpop.eup %366  ;;  %v103_v47 = vadd.f32 1.0, %v365_v44 }
  0xa2   :  { %368 = vpow2.f32 %v293_v45  ;;  %v121_v49 = vmul.f32 %v367_v46, %v102_v37  ;;  %v113_v54 = vsel %vm112_vm4, %v363_v36, %v109_v48  ;;  %vm126_vm5 = vweird.f32 %v367_v46 }
  0xa3   :  { %370 = vrcp.f32 %v103_v47  ;;  %v118_v62 = vsel %vm115_vm6, %v117_v57, %v113_v54  ;;  %vm127_vm8 = vmor %vm125_vm7, %vm126_vm5  ;;  %v146_v11 = vand.u32 2147483648, %v103_v47  ;;  %vm140_vm11 = vweird.f32 %v103_v47 }
  0xa4   :  { %v122_v52 = vsub.f32 1.0, %v121_v49  ;;  %v165_v3 = vmul.f32 %v118_v62, %v466_v16  ;;  %v144_v12 = vand.u32 2147483647, %v103_v47 }
  0xa5   :  { %v147_v16 = vor.u32 1.1754944e-38, %v146_v11 }
  0xa6   :  { %v123_v55 = vmul.f32 %v367_v46, %v122_v52  ;;  %vm145_vm14 = vcmp.eq.f32.partialorder %v144_v12, 8.507059e+37 }
  0xa8   :  { %v369_v58 = vpop.eup %368  ;;  %v124_v59 = vadd.f32 %v367_v46, %v123_v55 }
  0xa9   :  { %v371_v60 = vpop.eup %370  ;;  %v104_v61 = vadd.f32 1.0, %v369_v58 }
  0xaa   :  { %v128_v0 = vsel %vm127_vm8, %v367_v46, %v124_v59  ;;  %v136_v1 = vmul.f32 %v371_v60, %v103_v47  ;;  %vm141_vm10 = vweird.f32 %v371_v60 }
  0xab   :  { %372 = vrcp.f32 %v104_v61  ;;  %v133_v2 = vsel %vm130_vm9, %v132_v63, %v128_v0  ;;  %vm142_vm12 = vmor %vm140_vm11, %vm141_vm10  ;;  %v161_v14 = vand.u32 2147483648, %v104_v61  ;;  %v159_v18 = vand.u32 2147483647, %v104_v61 }
  0xac   :  { %v166_v4 = vmul.f32 %v133_v2, %v86_v24  ;;  %v137_v5 = vsub.f32 1.0, %v136_v1  ;;  %vm155_vm15 = vweird.f32 %v104_v61 }
  0xad   :  { %v162_v21 = vor.u32 1.1754944e-38, %v161_v14  ;;  %vm160_vm1 = vcmp.eq.f32.partialorder %v159_v18, 8.507059e+37 }
  0xae   :  { %v169_v6 = vpack.c.bf16 %v166_v4, %v165_v3  ;;  %v138_v7 = vmul.f32 %v371_v60, %v137_v5 }
  0xb0   :  { %243 = vmatmul.bf16.vlgmr.msra.gmra.mxu1 %v169_v6  ;;  %v139_v9 = vadd.f32 %v371_v60, %v138_v7 }
  0xb1   :  { %v373_v8 = vpop.eup %372 }
  0xb2   :  { %v151_v10 = vmul.f32 %v373_v8, %v104_v61  ;;  %v143_v15 = vsel %vm142_vm12, %v371_v60, %v139_v9  ;;  %vm156_vm13 = vweird.f32 %v373_v8 }
  0xb3   :  { %v148_v20 = vsel %vm145_vm14, %v147_v16, %v143_v15  ;;  %vm157_vm0 = vmor %vm155_vm15, %vm156_vm13 }
  0xb4   :  { %v152_v13 = vsub.f32 1.0, %v151_v10  ;;  %v167_v24 = vmul.f32 %v148_v20, %v475_v32 }
  0xb6   :  { %v153_v17 = vmul.f32 %v373_v8, %v152_v13 }
  0xb8   :  { %v154_v19 = vadd.f32 %v373_v8, %v153_v17 }
  0xba   :  { %v158_v22 = vsel %vm157_vm0, %v373_v8, %v154_v19 }
  0xbb   :  { %v163_v23 = vsel %vm160_vm1, %v162_v21, %v158_v22 }
  0xbc   :  { %v168_v25 = vmul.f32 %v163_v23, %v478_v42 }
  0xbe   :  { %v170_v26 = vpack.c.bf16 %v168_v25, %v167_v24 }
  0xc0   :  { %248 = vmatmul.bf16.vlgmr.msra.gmra.mxu2 %v170_v26 }
 0x12d   :  { %v244_v27 = vpop.f32.mrf.mxu1 }
 0x135   :  { %v246_v28 = vpop.f32.mrf.mxu1 }
 0x136   :  { %v339_v29 = vpack.c.bf16 %v246_v28, %v244_v27 }
 0x138   :  { %340 = vst [vmem:[#allocation2] sm:$0xff] %v339_v29  }
 0x143   :  { %v249_v30 = vpop.f32.mrf.mxu2 }
 0x14b   :  { %v251_v31 = vpop.f32.mrf.mxu2 }
 0x14c   :  { %v344_v33 = vpack.c.bf16 %v251_v31, %v249_v30 }
 0x14e   :  { %346 = vst [vmem:[#allocation2 + $0x8] sm:$0xff] %v344_v33  }
 0x14f   :  { %274 = dma.vmem_to_hbm [thread:$0]  %s267_s15, 256, %s269_s18, [#allocation3], %s401_s19, %s401_s19, %s402_s20  }
 0x150   :  { %398 = dma.done.wait [#allocation3], 256  }
 0x151   :  { %399 = vsyncadd [#allocation3], 4294967040 }
 0x152   :  { %279 = vsyncpa [#allocation3], 1 }

</bundles_post_ra>
